<compile_context>
chip_gen: v6e
topology: v6e:2x2x1
jax: 0.10.0
libtpu: 0.0.40
codegen_flags: <defaults>
</compile_context>

<pallas_src>
import jax
import jax.numpy as jnp
from jax.experimental import pallas as pl
from jax.experimental.pallas import tpu as pltpu

BN_EPS = 1e-05

# Hard VMEM cap: safe on every target (v5e/v6e: 128 MiB physical, v7x: 64 MiB
# per TensorCore -> 16 MiB headroom left for Mosaic internal scratch).
_VMEM_BUDGET = 48 * 1024 * 1024


# ---------------------------------------------------------------------------
# In-kernel helpers (traced inside the Pallas body).
# ---------------------------------------------------------------------------
def _swish(v):
    # i * sigmoid(i).  The reciprocal goes to the EUP (approx) so the two Swish
    # passes do not compete with BatchNorm's VALU work (matters on v5e).
    return v * pl.reciprocal(1.0 + jnp.exp(-v), approx=True)


def _batchnorm_train(v, gamma, beta):
    # Training-mode BN: biased batch statistics.  Two-pass variance (mean first,
    # then centered second moment) for numerical safety vs. E[x^2]-E[x]^2.
    mean = jnp.mean(v, axis=0, keepdims=True)
    c = v - mean
    var = jnp.mean(c * c, axis=0, keepdims=True)
    return c * jax.lax.rsqrt(var + BN_EPS) * gamma + beta


# ---------------------------------------------------------------------------
# Kernels.
# ---------------------------------------------------------------------------
def _fused_kernel(x_ref, w1_ref, g1_ref, b1_ref, w2_ref, g2_ref, b2_ref, o_ref):
    """Whole ResBlock in one invocation (no grid, everything resident)."""
    x = x_ref[...]                                    # f32, also the skip path
    mm = w1_ref.dtype
    h = jnp.dot(x.astype(mm), w1_ref[...], preferred_element_type=jnp.float32)
    h = _swish(_batchnorm_train(h, g1_ref[...], b1_ref[...]))
    y = jnp.dot(h.astype(mm), w2_ref[...], preferred_element_type=jnp.float32)
    y = _batchnorm_train(y, g2_ref[...], b2_ref[...])
    z = x + y                                         # f32 residual (PyTorch fidelity)
    o_ref[...] = _swish(z).astype(o_ref.dtype)


def _stage1_kernel(x_ref, w1_ref, g1_ref, b1_ref, h_ref):
    """h = Swish(BN1(x @ w1)), written once to HBM (large-d_out path)."""
    xb = x_ref[...].astype(w1_ref.dtype)
    h = jnp.dot(xb, w1_ref[...], preferred_element_type=jnp.float32)
    h_ref[...] = _swish(_batchnorm_train(h, g1_ref[...], b1_ref[...])).astype(h_ref.dtype)


def _stage2_kernel(xres_ref, h_ref, w2_ref, g2_ref, b2_ref, o_ref):
    """Per output-feature tile: BN2(h @ w2_tile), residual add, Swish."""
    y = jnp.dot(h_ref[...], w2_ref[...], preferred_element_type=jnp.float32)
    y = _batchnorm_train(y, g2_ref[...], b2_ref[...])
    z = xres_ref[...] + y                             # f32 skip connection
    o_ref[...] = _swish(z).astype(o_ref.dtype)


# ---------------------------------------------------------------------------
# VMEM sizing / tile selection.
# ---------------------------------------------------------------------------
def _fused_vmem_est(B, D, H, mm, osz):
    io = B * D * 4 + D * H * mm + H * D * mm + 2 * H * 4 + 2 * D * 4 + B * D * osz
    interm = 3 * B * D * 4 + 2 * B * H * 4
    return int(1.25 * (io + interm))


def _stage2_vmem_est(B, H, tn, mm, osz):
    streamed = B * tn * 4 + H * tn * mm + 2 * tn * 4 + B * tn * osz
    resident = B * H * mm
    interm = 3 * B * tn * 4 + B * H * 4
    # streamed + resident blocks are double-buffered by the Pallas pipeline.
    return int(1.25 * (2 * (streamed + resident) + interm))


def _pick_tn(d_out, B, H, mm, osz, max_tn):
    """Largest 128-multiple divisor of d_out, <= max_tn, that fits the budget."""
    best = None
    tn = 128
    limit = min(d_out, max(int(max_tn), 128))
    while tn <= limit:
        if d_out % tn == 0 and _stage2_vmem_est(B, H, tn, mm, osz) <= _VMEM_BUDGET:
            best = tn
        tn += 128
    if best is None:
        # TODO(synk): also tile the batch when even a 128-wide tile overflows VMEM.
        raise ValueError("no 128-multiple output tile fits the VMEM budget")
    return best


# ---------------------------------------------------------------------------
# Wrapper.
# ---------------------------------------------------------------------------
def resblock_forward(x, w1, g1, b1, w2, g2, b2, *, matmul_dtype=jnp.bfloat16,
                     out_dtype=None, max_tn=512, force_tiled=False):
    """x: (B, input_dim) float.  w1: (input_dim, hidden), w2: (hidden, output_dim)
    (already transposed from PyTorch nn.Linear's (out, in) layout).
    g*/b*: BatchNorm affine params, shapes (hidden,)/(1,hidden) and
    (output_dim,)/(1,output_dim)."""
    B, D = x.shape
    d_in, H = w1.shape
    h2, d_out = w2.shape
    assert d_in == D and h2 == H and d_out == D, "residual requires input_dim == output_dim"

    out_dtype = jnp.dtype(x.dtype if out_dtype is None else out_dtype)
    mm = jnp.dtype(matmul_dtype).itemsize
    osz = out_dtype.itemsize

    x = x.astype(jnp.float32)          # f32 skip path; cast to matmul dtype in-kernel
    w1q = w1.astype(matmul_dtype)      # low-precision MXU operands, f32 accumulation
    w2q = w2.astype(matmul_dtype)      # (matmul_dtype can be an fp8 dtype on v7x)
    g1 = jnp.asarray(g1, jnp.float32).reshape(1, H)
    b1 = jnp.asarray(b1, jnp.float32).reshape(1, H)
    g2 = jnp.asarray(g2, jnp.float32).reshape(1, d_out)
    b2 = jnp.asarray(b2, jnp.float32).reshape(1, d_out)

    base_params = pltpu.CompilerParams(vmem_limit_bytes=_VMEM_BUDGET)

    if not force_tiled and _fused_vmem_est(B, D, H, mm, osz) <= _VMEM_BUDGET:
        # Everything (including the default ResBlock(512, 512) sizes) fits VMEM:
        # single un-gridded call -> zero per-step pipeline overhead, no scratch
        # handoff, single-buffered operands.
        return pl.pallas_call(
            _fused_kernel,
            out_shape=jax.ShapeDtypeStruct((B, d_out), out_dtype),
            compiler_params=base_params,
        )(x, w1q, g1, b1, w2q, g2, b2)

    # ---- Large-d_out path: stage 1 once, then a parallel feature-tiled stage 2 ----
    assert d_out % 128 == 0, "tiled path requires output_dim % 128 == 0 (lane-dense tiles)"
    tn = _pick_tn(d_out, B, H, mm, osz, max_tn)
    n_tiles = d_out // tn

    # TODO(synk): stage 1 assumes x (B, D) and w1 (D, H) fit VMEM together;
    # K-tile the first matmul if ever needed for very large batch * input_dim.
    h = pl.pallas_call(
        _stage1_kernel,
        out_shape=jax.ShapeDtypeStruct((B, H), matmul_dtype),
        compiler_params=base_params,
    )(x, w1q, g1, b1)

    return pl.pallas_call(
        _stage2_kernel,
        out_shape=jax.ShapeDtypeStruct((B, d_out), out_dtype),
        grid=(n_tiles,),
        in_specs=[
            pl.BlockSpec((B, tn), lambda j: (0, j)),   # f32 x residual tile (lane-dense)
            pl.BlockSpec((B, H), lambda j: (0, 0)),    # h: only block-invariant input (tiny)
            pl.BlockSpec((H, tn), lambda j: (0, j)),   # w2 tile (streamed / pipelined)
            pl.BlockSpec((1, tn), lambda j: (0, j)),   # gamma2 tile
            pl.BlockSpec((1, tn), lambda j: (0, j)),   # beta2 tile
        ],
        out_specs=pl.BlockSpec((B, tn), lambda j: (0, j)),   # lane-dense output tile
        compiler_params=pltpu.CompilerParams(
            # No shared scratch / sequential dependence across tiles -> the tile
            # axis is truly parallel (shards across both TensorCores on v7x).
            dimension_semantics=("parallel",),
            vmem_limit_bytes=_VMEM_BUDGET,
        ),
    )(x, h, w2q, g2, b2)


# ---------------------------------------------------------------------------
# Demo / correctness check.
# ---------------------------------------------------------------------------
if __name__ == "__main__":
    key = jax.random.PRNGKey(0)
    B = 32                        # batch > 1 so BN batch stats are well defined
    input_dim = output_dim = 256  # lane-friendly small demo shape
    hidden = output_dim // 4      # 64, as in the module

    ks = jax.random.split(key, 7)
    x = jax.random.normal(ks[0], (B, input_dim), jnp.float32)

    # nn.Linear stores weight as (out, in); kernel consumes (in, out).
    w1 = (jax.random.normal(ks[1], (hidden, input_dim), jnp.float32) * 0.05).T
    w2 = (jax.random.normal(ks[2], (output_dim, hidden), jnp.float32) * 0.05).T

    # BatchNorm affine params (deterministic synthetic init).
    g1 = 1.0 + 0.05 * jax.random.normal(ks[3], (1, hidden), jnp.float32)
    b1 = 0.05 * jax.random.normal(ks[4], (1, hidden), jnp.float32)
    g2 = 1.0 + 0.05 * jax.random.normal(ks[5], (1, output_dim), jnp.float32)
    b2 = 0.05 * jax.random.normal(ks[6], (1, output_dim), jnp.float32)

    # Pure-JAX reference: bf16 MXU operands / f32 accumulation, f32 skip path.
    def ref(xf):
        xb = xf.astype(jnp.bfloat16)
        h = jnp.dot(xb, w1.astype(jnp.bfloat16), preferred_element_type=jnp.float32)
        m = h.mean(0, keepdims=True); c = h - m; v = (c * c).mean(0, keepdims=True)
        h = c / jnp.sqrt(v + BN_EPS) * g1 + b1
        h = h * jax.nn.sigmoid(h)
        y = jnp.dot(h.astype(jnp.bfloat16), w2.astype(jnp.bfloat16),
                    preferred_element_type=jnp.float32)
        m = y.mean(0, keepdims=True); c = y - m; v = (c * c).mean(0, keepdims=True)
        y = c / jnp.sqrt(v + BN_EPS) * g2 + b2
        z = xf + y                                  # f32 skip, PyTorch fidelity
        return z * jax.nn.sigmoid(z)

    r = ref(x)

    # Path 1: fits the VMEM budget -> single fused un-gridded call.
    out_fused = resblock_forward(x, w1, g1, b1, w2, g2, b2)
    jax.block_until_ready(out_fused)
    err = jnp.max(jnp.abs(out_fused - r))
    assert jnp.allclose(out_fused, r, atol=2e-2, rtol=2e-2), f"fused mismatch (max abs err={err})"

    # Path 2: force the two-call split (parallel feature-tiled stage 2) for coverage.
    out_tiled = resblock_forward(x, w1, g1, b1, w2, g2, b2,
                                 force_tiled=True, max_tn=128)
    jax.block_until_ready(out_tiled)
    err = jnp.max(jnp.abs(out_tiled - r))
    assert jnp.allclose(out_tiled, r, atol=2e-2, rtol=2e-2), f"tiled mismatch (max abs err={err})"

    print("KERNEL_OK")
</pallas_src>

<mosaic_0001>
module attributes {stable_mosaic.version = 11 : i64} {
  func.func @_fused_kernel(%arg0: memref<32x256xf32, #tpu.memory_space<vmem>>, %arg1: memref<256x64xbf16, #tpu.memory_space<vmem>>, %arg2: memref<1x64xf32, #tpu.memory_space<vmem>>, %arg3: memref<1x64xf32, #tpu.memory_space<vmem>>, %arg4: memref<64x256xbf16, #tpu.memory_space<vmem>>, %arg5: memref<1x256xf32, #tpu.memory_space<vmem>>, %arg6: memref<1x256xf32, #tpu.memory_space<vmem>>, %arg7: memref<32x256xf32, #tpu.memory_space<vmem>>) attributes {dimension_semantics = [], scalar_prefetch = 0 : i64, scratch_operands = 0 : i64, tpu.core_type = #tpu.core_type<tc>} {
    %c0 = arith.constant 0 : index
    %c0_0 = arith.constant 0 : index
    %0 = vector.load %arg0[%c0, %c0_0] : memref<32x256xf32, #tpu.memory_space<vmem>>, vector<32x256xf32>
    %1 = arith.truncf %0 : vector<32x256xf32> to vector<32x256xbf16>
    %c0_1 = arith.constant 0 : index
    %c0_2 = arith.constant 0 : index
    %2 = vector.load %arg1[%c0_1, %c0_2] : memref<256x64xbf16, #tpu.memory_space<vmem>>, vector<256x64xbf16>
    %cst = arith.constant dense<0.000000e+00> : vector<32x64xf32>
    %3 = tpu.matmul %1, %2, %cst {dimension_numbers = #tpu.dot_dimension_numbers<[1], [0], [0], [1], [0, 0, 1, 1], [], []>} : vector<32x256xbf16>, vector<256x64xbf16>, vector<32x64xf32> -> vector<32x64xf32>
    %c0_3 = arith.constant 0 : index
    %c0_4 = arith.constant 0 : index
    %4 = vector.load %arg2[%c0_3, %c0_4] : memref<1x64xf32, #tpu.memory_space<vmem>>, vector<1x64xf32>
    %c0_5 = arith.constant 0 : index
    %c0_6 = arith.constant 0 : index
    %5 = vector.load %arg3[%c0_5, %c0_6] : memref<1x64xf32, #tpu.memory_space<vmem>>, vector<1x64xf32>
    %cst_7 = arith.constant dense<0.000000e+00> : vector<64xf32>
    %6 = vector.multi_reduction <add>, %3, %cst_7 [0] : vector<32x64xf32> to vector<64xf32>
    %7 = vector.shape_cast %6 : vector<64xf32> to vector<1x64xf32>
    %cst_8 = arith.constant 3.200000e+01 : f32
    %8 = vector.broadcast %cst_8 : f32 to vector<1x64xf32>
    %9 = arith.divf %7, %8 : vector<1x64xf32>
    %10 = vector.broadcast %9 : vector<1x64xf32> to vector<32x64xf32>
    %11 = arith.subf %3, %10 : vector<32x64xf32>
    %12 = arith.mulf %11, %11 : vector<32x64xf32>
    %cst_9 = arith.constant dense<0.000000e+00> : vector<64xf32>
    %13 = vector.multi_reduction <add>, %12, %cst_9 [0] : vector<32x64xf32> to vector<64xf32>
    %14 = vector.shape_cast %13 : vector<64xf32> to vector<1x64xf32>
    %cst_10 = arith.constant 3.200000e+01 : f32
    %15 = vector.broadcast %cst_10 : f32 to vector<1x64xf32>
    %16 = arith.divf %14, %15 : vector<1x64xf32>
    %cst_11 = arith.constant 9.99999974E-6 : f32
    %17 = vector.broadcast %cst_11 : f32 to vector<1x64xf32>
    %18 = arith.addf %16, %17 : vector<1x64xf32>
    %19 = math.rsqrt %18 : vector<1x64xf32>
    %20 = vector.broadcast %19 : vector<1x64xf32> to vector<32x64xf32>
    %21 = arith.mulf %11, %20 : vector<32x64xf32>
    %22 = vector.broadcast %4 : vector<1x64xf32> to vector<32x64xf32>
    %23 = arith.mulf %21, %22 : vector<32x64xf32>
    %24 = vector.broadcast %5 : vector<1x64xf32> to vector<32x64xf32>
    %25 = arith.addf %23, %24 : vector<32x64xf32>
    %cst_12 = arith.constant 0.000000e+00 : f32
    %26 = vector.broadcast %cst_12 : f32 to vector<32x64xf32>
    %27 = arith.subf %26, %25 : vector<32x64xf32>
    %28 = math.exp %27 : vector<32x64xf32>
    %cst_13 = arith.constant 1.000000e+00 : f32
    %29 = vector.broadcast %cst_13 : f32 to vector<32x64xf32>
    %30 = arith.addf %29, %28 : vector<32x64xf32>
    %31 = tpu.reciprocal %30 {approx = true} : vector<32x64xf32> -> vector<32x64xf32>
    %32 = arith.mulf %25, %31 : vector<32x64xf32>
    %33 = arith.truncf %32 : vector<32x64xf32> to vector<32x64xbf16>
    %c0_14 = arith.constant 0 : index
    %c0_15 = arith.constant 0 : index
    %34 = vector.load %arg4[%c0_14, %c0_15] : memref<64x256xbf16, #tpu.memory_space<vmem>>, vector<64x256xbf16>
    %cst_16 = arith.constant dense<0.000000e+00> : vector<32x256xf32>
    %35 = tpu.matmul %33, %34, %cst_16 {dimension_numbers = #tpu.dot_dimension_numbers<[1], [0], [0], [1], [0, 0, 1, 1], [], []>} : vector<32x64xbf16>, vector<64x256xbf16>, vector<32x256xf32> -> vector<32x256xf32>
    %c0_17 = arith.constant 0 : index
    %c0_18 = arith.constant 0 : index
    %36 = vector.load %arg5[%c0_17, %c0_18] : memref<1x256xf32, #tpu.memory_space<vmem>>, vector<1x256xf32>
    %c0_19 = arith.constant 0 : index
    %c0_20 = arith.constant 0 : index
    %37 = vector.load %arg6[%c0_19, %c0_20] : memref<1x256xf32, #tpu.memory_space<vmem>>, vector<1x256xf32>
    %cst_21 = arith.constant dense<0.000000e+00> : vector<256xf32>
    %38 = vector.multi_reduction <add>, %35, %cst_21 [0] : vector<32x256xf32> to vector<256xf32>
    %39 = vector.shape_cast %38 : vector<256xf32> to vector<1x256xf32>
    %cst_22 = arith.constant 3.200000e+01 : f32
    %40 = vector.broadcast %cst_22 : f32 to vector<1x256xf32>
    %41 = arith.divf %39, %40 : vector<1x256xf32>
    %42 = vector.broadcast %41 : vector<1x256xf32> to vector<32x256xf32>
    %43 = arith.subf %35, %42 : vector<32x256xf32>
    %44 = arith.mulf %43, %43 : vector<32x256xf32>
    %cst_23 = arith.constant dense<0.000000e+00> : vector<256xf32>
    %45 = vector.multi_reduction <add>, %44, %cst_23 [0] : vector<32x256xf32> to vector<256xf32>
    %46 = vector.shape_cast %45 : vector<256xf32> to vector<1x256xf32>
    %cst_24 = arith.constant 3.200000e+01 : f32
    %47 = vector.broadcast %cst_24 : f32 to vector<1x256xf32>
    %48 = arith.divf %46, %47 : vector<1x256xf32>
    %cst_25 = arith.constant 9.99999974E-6 : f32
    %49 = vector.broadcast %cst_25 : f32 to vector<1x256xf32>
    %50 = arith.addf %48, %49 : vector<1x256xf32>
    %51 = math.rsqrt %50 : vector<1x256xf32>
    %52 = vector.broadcast %51 : vector<1x256xf32> to vector<32x256xf32>
    %53 = arith.mulf %43, %52 : vector<32x256xf32>
    %54 = vector.broadcast %36 : vector<1x256xf32> to vector<32x256xf32>
    %55 = arith.mulf %53, %54 : vector<32x256xf32>
    %56 = vector.broadcast %37 : vector<1x256xf32> to vector<32x256xf32>
    %57 = arith.addf %55, %56 : vector<32x256xf32>
    %58 = arith.addf %0, %57 : vector<32x256xf32>
    %cst_26 = arith.constant 0.000000e+00 : f32
    %59 = vector.broadcast %cst_26 : f32 to vector<32x256xf32>
    %60 = arith.subf %59, %58 : vector<32x256xf32>
    %61 = math.exp %60 : vector<32x256xf32>
    %cst_27 = arith.constant 1.000000e+00 : f32
    %62 = vector.broadcast %cst_27 : f32 to vector<32x256xf32>
    %63 = arith.addf %62, %61 : vector<32x256xf32>
    %64 = tpu.reciprocal %63 {approx = true} : vector<32x256xf32> -> vector<32x256xf32>
    %65 = arith.mulf %58, %64 : vector<32x256xf32>
    %c0_28 = arith.constant 0 : index
    %c0_29 = arith.constant 0 : index
    %66 = vector.load %arg7[%c0_28, %c0_29] : memref<32x256xf32, #tpu.memory_space<vmem>>, vector<32x256xf32>
    tpu.vector_store %arg7[%c0_28, %c0_29], %65 {strides = array<i32>} : memref<32x256xf32, #tpu.memory_space<vmem>>, vector<32x256xf32>,
    return
  }
}

</mosaic_0001>

<bundles_post_ra>
// kernel: tpu_custom_call.1
= control target key start
LH: loop header
LB: loop body
LE: loop exit
PB: predicated region body
PF: predicated region fallthrough
CT: control target
= control target key end

     0   :  { %s995_s0 = inlined_call_operand.vmem [shape: f32[32,256], index: 0, kind: input, shape index: {}]   ;;  %s996_s1 = inlined_call_operand.vmem [shape: bf16[256,64], index: 1, kind: input, shape index: {}]   ;;  %s997_s2 = inlined_call_operand.vmem [shape: f32[1,64], index: 2, kind: input, shape index: {}]   ;;  %s998_s3 = inlined_call_operand.vmem [shape: f32[1,64], index: 3, kind: input, shape index: {}]   ;;  %s999_s4 = inlined_call_operand.vmem [shape: bf16[64,256], index: 4, kind: input, shape index: {}]   ;;  %s1000_s5 = inlined_call_operand.vmem [shape: f32[1,256], index: 5, kind: input, shape index: {}]   ;;  %s1001_s6 = inlined_call_operand.vmem [shape: f32[1,256], index: 6, kind: input, shape index: {}]   ;;  %s1002_s7 = inlined_call_operand.hbm [shape: f32[32,256], index: 7, kind: output, shape index: {}]  }
   0x1   :  { %v664_v0 = vld [vmem:[%s996_s1 + $0x78] sm:$0xff]   ;;  %v666_v2 = vld [vmem:[%s996_s1 + $0x70] sm:$0xff]   ;;  %v668_v4 = vld [vmem:[%s996_s1 + $0x68] sm:$0xff]  }
   0x2   :  { %v665_v1 = vld [vmem:[%s996_s1 + $0x38] sm:$0xff]   ;;  %632 = vmatprep.subr.bf16.mxu0 %v664_v0  ;;  %v667_v3 = vld [vmem:[%s996_s1 + $0x30] sm:$0xff]   ;;  %v669_v5 = vld [vmem:[%s996_s1 + $0x28] sm:$0xff]  }
   0x3   :  { %633 = vmatpush3.bf16.msra.mxu0 %v665_v1  ;;  %v670_v6 = vld [vmem:[%s996_s1 + $0x60] sm:$0xff]   ;;  %v672_v8 = vld [vmem:[%s996_s1 + $0x58] sm:$0xff]   ;;  %v674_v10 = vld [vmem:[%s996_s1 + $0x50] sm:$0xff]  }
   0x4   :  { %634 = vmatprep.subr.bf16.mxu0 %v666_v2  ;;  %v671_v7 = vld [vmem:[%s996_s1 + $0x20] sm:$0xff]   ;;  %v673_v9 = vld [vmem:[%s996_s1 + $0x18] sm:$0xff]   ;;  %v848_v11 = vld [vmem:[%s995_s0 + $0x8] sm:$0xff] }
   0x5   :  { %v853_v12 = vld [vmem:[%s995_s0 + $0x18] sm:$0xff]  ;;  %v675_v14 = vld [vmem:[%s996_s1 + $0x10] sm:$0xff]   ;;  %v676_v15 = vld [vmem:[%s996_s1 + $0x48] sm:$0xff]  }
   0x6   :  { %v37_v13 = vpack.c.bf16 %v853_v12, %v848_v11 }
   0x7   :  { %635 = vmatpush3.bf16.msra.mxu0 %v667_v3 }
   0x8   :  { %636 = vmatprep.subr.bf16.mxu0 %v668_v4  ;;  %200 = vmatprep.mubr.bf16.mxu0 %v37_v13 }
   0xb   :  { %637 = vmatpush3.bf16.msra.mxu0 %v669_v5 }
   0xc   :  { %638 = vmatprep.subr.bf16.mxu0 %v670_v6 }
   0xf   :  { %639 = vmatpush3.bf16.msra.mxu0 %v671_v7 }
  0x10   :  { %640 = vmatprep.subr.bf16.mxu0 %v672_v8 }
  0x13   :  { %641 = vmatpush3.bf16.msra.mxu0 %v673_v9 }
  0x14   :  { %642 = vmatprep.subr.bf16.mxu0 %v674_v10 }
  0x15   :  { %12 = vsyncpa [#allocation3], 0  ;;  %v677_v16 = vld [vmem:[%s996_s1 + $0x8] sm:$0xff]   ;;  %v678_v17 = vld [vmem:[%s996_s1 + $0x40] sm:$0xff]   ;;  %v768_v32 = vmov 0   ;;  %vm219_vm0 = vcmask 523264  }
  0x16   :  { %v679_v18 = vld [vmem:[%s996_s1] sm:$0xff]   ;;  %v880_v20 = vld [vmem:[%s995_s0 + $0x10] sm:$0xff]  ;;  %v885_v21 = vld [vmem:[%s995_s0 + $0x28] sm:$0xff]  ;;  %395 = vmatprep.mubr.bf16.mxu1 %v768_v32 }
  0x17   :  { %643 = vmatpush3.bf16.msra.mxu0 %v675_v14  ;;  %v875_v19 = vld [vmem:[%s995_s0] sm:$0xff]  ;;  %v890_v22 = vld [vmem:[%s995_s0 + $0x38] sm:$0xff]  ;;  %v904_v26 = vld [vmem:[%s995_s0 + $0x30] sm:$0xff] }
  0x18   :  { %644 = vmatprep.subr.bf16.mxu0 %v676_v15  ;;  %v36_v23 = vpack.c.bf16 %v880_v20, %v875_v19  ;;  %v39_v24 = vpack.c.bf16 %v890_v22, %v885_v21  ;;  %v899_v25 = vld [vmem:[%s995_s0 + $0x20] sm:$0xff]  ;;  %v680_v28 = vld [vmem:[%s999_s4 + $0x34] ss:$8 sps:$4 sm:$0xff]   ;;  %v682_v29 = vld [vmem:[%s999_s4 + $0x30] ss:$8 sps:$4 sm:$0xff]  }
  0x19   :  { %v38_v27 = vpack.c.bf16 %v904_v26, %v899_v25  ;;  %v683_v30 = vld [vmem:[%s999_s4 + $0x24] ss:$8 sps:$4 sm:$0xff]   ;;  %371 = vmatprep.subr.bf16.mxu1 %v680_v28  ;;  %v685_v31 = vld [vmem:[%s999_s4 + $0x20] ss:$8 sps:$4 sm:$0xff]   ;;  %v686_v33 = vld [vmem:[%s999_s4 + $0x14] ss:$8 sps:$4 sm:$0xff]  }
  0x1a   :  { %372 = vmatpush1.bf16.msra.mxu1 %v682_v29  ;;  %v688_v34 = vld [vmem:[%s999_s4 + $0x10] ss:$8 sps:$4 sm:$0xff]   ;;  %v689_v35 = vld [vmem:[%s999_s4 + $0x4] ss:$8 sps:$4 sm:$0xff]   ;;  %v691_v36 = vld [vmem:[%s999_s4] ss:$8 sps:$4 sm:$0xff]  }
  0x1b   :  { %645 = vmatpush3.bf16.msra.mxu0 %v677_v16  ;;  %373 = vmatprep.subr.bf16.mxu1 %v683_v30 }
  0x1c   :  { %646 = vmatprep.subr.bf16.mxu0 %v678_v17 }
  0x1e   :  { %374 = vmatpush1.bf16.msra.mxu1 %v685_v31  ;;  %v620_v31 = vld [vmem:[%s997_s2] ss:$0 sm:$0xff] }
  0x1f   :  { %647 = vmatpush3.bf16.msra.mxu0 %v679_v18  ;;  %375 = vmatprep.subr.bf16.mxu1 %v686_v33 }
  0x22   :  { %201 = vmatmul.mubr.bf16.vlgmr.msra.gmra.mxu0 %v36_v23  ;;  %376 = vmatpush1.bf16.msra.mxu1 %v688_v34 }
  0x23   :  { %208 = vmatprep.mubr.bf16.mxu0 %v39_v24  ;;  %377 = vmatprep.subr.bf16.mxu1 %v689_v35 }
  0x26   :  { %378 = vmatpush1.bf16.msra.mxu1 %v691_v36 }
  0x2a   :  { %209 = vmatmul.mubr.bf16.gmra.mxu0 %v38_v27 }
  0xe2   :  { %v648_v37 = vpop.f32.mrf.mxu0 }
  0xe4   :  { %v649_v38 = vpop.f32.mrf.mxu0 }
  0xe5   :  { %v650_v43 = vadd.f32 %v649_v38, %v648_v37  ;;  %v621_v37 = vld [vmem:[%s998_s3] ss:$0 sm:$0xff] }
  0xe6   :  { %v651_v39 = vpop.f32.mrf.mxu0 }
  0xe7   :  { %v220_v48 = vsel %vm219_vm0, %v650_v43, 0.0 }
  0xe8   :  { %v652_v40 = vpop.f32.mrf.mxu0 }
  0xe9   :  { %v653_v41 = vadd.f32 %v652_v40, %v651_v39 }
  0xea   :  { %v654_v42 = vpop.f32.mrf.mxu0 }
  0xeb   :  { %v221_v45 = vsel %vm219_vm0, %v653_v41, 0.0 }
  0xec   :  { %v655_v44 = vpop.f32.mrf.mxu0  ;;  %v222_v50 = vadd.f32 %v221_v45, %v220_v48 }
  0xed   :  { %v656_v46 = vadd.f32 %v655_v44, %v654_v42 }
  0xee   :  { %v657_v47 = vpop.f32.mrf.mxu0 }
  0xef   :  { %v223_v49 = vsel %vm219_vm0, %v656_v46, 0.0 }
  0xf0   :  { %v658_v51 = vpop.f32.mrf.mxu0  ;;  %v224_v53 = vadd.f32 %v223_v49, %v222_v50 }
  0xf1   :  { %v659_v52 = vadd.f32 %v658_v51, %v657_v47 }
  0xf3   :  { %v225_v54 = vsel %vm219_vm0, %v659_v52, 0.0 }
  0xf4   :  { %v226_v55 = vadd.f32 %v225_v54, %v224_v53 }
  0xf6   :  { %v227_v56 = vrot.slane %v226_v55, 4 }
  0xf8   :  { %v228_v57 = vadd.f32 %v227_v56, %v226_v55 }
  0xfa   :  { %v229_v58 = vrot.slane %v228_v57, 2 }
  0xfc   :  { %v230_v59 = vadd.f32 %v229_v58, %v228_v57 }
  0xfe   :  { %v231_v60 = vrot.slane %v230_v59, 1 }
 0x100   :  { %v232_v61 = vadd.f32 %v231_v60, %v230_v59 }
 0x102   :  { %v234_v62 = vmul.f32 0.03125, %v232_v61 }
 0x104   :  { %v235_v63 = vsub.f32 %v650_v43, %v234_v62  ;;  %v236_v0 = vsub.f32 %v653_v41, %v234_v62  ;;  %v237_v1 = vsub.f32 %v656_v46, %v234_v62  ;;  %v238_v2 = vsub.f32 %v659_v52, %v234_v62 }
 0x106   :  { %v239_v3 = vmul.f32 %v235_v63, %v235_v63  ;;  %v240_v4 = vmul.f32 %v236_v0, %v236_v0  ;;  %v241_v5 = vmul.f32 %v237_v1, %v237_v1  ;;  %v242_v6 = vmul.f32 %v238_v2, %v238_v2 }
 0x108   :  { %v243_v7 = vsel %vm219_vm0, %v239_v3, 0.0  ;;  %v244_v8 = vsel %vm219_vm0, %v240_v4, 0.0  ;;  %v246_v10 = vsel %vm219_vm0, %v241_v5, 0.0  ;;  %v248_v14 = vsel %vm219_vm0, %v242_v6, 0.0 }
 0x109   :  { %v245_v9 = vadd.f32 %v244_v8, %v243_v7 }
 0x10b   :  { %v247_v13 = vadd.f32 %v246_v10, %v245_v9 }
 0x10d   :  { %v249_v15 = vadd.f32 %v248_v14, %v247_v13 }
 0x10f   :  { %v250_v16 = vrot.slane %v249_v15, 4 }
 0x111   :  { %v251_v17 = vadd.f32 %v250_v16, %v249_v15 }
 0x113   :  { %v252_v18 = vrot.slane %v251_v17, 2 }
 0x115   :  { %v253_v23 = vadd.f32 %v252_v18, %v251_v17 }
 0x117   :  { %v254_v24 = vrot.slane %v253_v23, 1 }
 0x119   :  { %v255_v27 = vadd.f32 %v254_v24, %v253_v23 }
 0x11b   :  { %v256_v28 = vmul.f32 0.03125, %v255_v27 }
 0x11d   :  { %v257_v29 = vadd.f32 1e-05, %v256_v28 }
 0x11f   :  { %692 = vrsqrt.f32 %v257_v29 }
 0x12c   :  { %v693_v30 = vpop.eup %692 }
 0x12d   :  { %v262_v33 = vmul.f32 %v693_v30, %v238_v2  ;;  %v259_v34 = vmul.f32 %v693_v30, %v235_v63  ;;  %v260_v35 = vmul.f32 %v693_v30, %v236_v0  ;;  %v261_v36 = vmul.f32 %v693_v30, %v237_v1 }
 0x12f   :  { %v272_v38 = vmul.f32 %v620_v31, %v262_v33  ;;  %v269_v39 = vmul.f32 %v620_v31, %v259_v34  ;;  %v270_v40 = vmul.f32 %v620_v31, %v260_v35  ;;  %v271_v41 = vmul.f32 %v620_v31, %v261_v36 }
 0x131   :  { %v282_v42 = vadd.f32 %v621_v37, %v272_v38  ;;  %v279_v43 = vadd.f32 %v621_v37, %v269_v39  ;;  %v280_v44 = vadd.f32 %v621_v37, %v270_v40  ;;  %v281_v45 = vadd.f32 %v621_v37, %v271_v41 }
 0x133   :  { %v286_v46 = vsub.f32 0.0, %v282_v42  ;;  %v283_v47 = vsub.f32 0.0, %v279_v43  ;;  %v284_v48 = vsub.f32 0.0, %v280_v44  ;;  %v285_v49 = vsub.f32 0.0, %v281_v45 }
 0x135   :  { %v293_v50 = vmul.f32 1.442695, %v286_v46  ;;  %v287_v51 = vmul.f32 1.442695, %v283_v47  ;;  %v289_v52 = vmul.f32 1.442695, %v284_v48 }
 0x136   :  { %v291_v53 = vmul.f32 1.442695, %v285_v49 }
 0x137   :  { %694 = vpow2.f32 %v293_v50 }
 0x138   :  { %696 = vpow2.f32 %v287_v51 }
 0x139   :  { %698 = vpow2.f32 %v289_v52 }
 0x13a   :  { %700 = vpow2.f32 %v291_v53 }
 0x144   :  { %v695_v54 = vpop.eup %694 }
 0x145   :  { %v697_v55 = vpop.eup %696  ;;  %v298_v60 = vadd.f32 1.0, %v695_v54 }
 0x146   :  { %v699_v56 = vpop.eup %698  ;;  %v295_v57 = vadd.f32 1.0, %v697_v55 }
 0x147   :  { %v701_v58 = vpop.eup %700  ;;  %v296_v59 = vadd.f32 1.0, %v699_v56 }
 0x148   :  { %702 = vrcp.f32 %v295_v57  ;;  %v297_v61 = vadd.f32 1.0, %v701_v58 }
 0x149   :  { %704 = vrcp.f32 %v296_v59 }
 0x14a   :  { %706 = vrcp.f32 %v298_v60 }
 0x14b   :  { %708 = vrcp.f32 %v297_v61 }
 0x155   :  { %v703_v62 = vpop.eup %702 }
 0x156   :  { %v705_v63 = vpop.eup %704  ;;  %v303_v0 = vmul.f32 %v703_v62, %v279_v43 }
 0x157   :  { %v304_v1 = vmul.f32 %v705_v63, %v280_v44  ;;  %v707_v2 = vpop.eup %706 }
 0x158   :  { %v709_v4 = vpop.eup %708  ;;  %v306_v6 = vmul.f32 %v707_v2, %v282_v42 }
 0x159   :  { %v307_v3 = vpack.c.bf16 %v304_v1, %v303_v0  ;;  %v305_v5 = vmul.f32 %v709_v4, %v281_v45 }
 0x15b   :  { %630 = vmatmul.mubr.msk.bf16.vlgmr.msra.gmra.mxu1 %vm219_vm0, %v307_v3  ;;  %v308_v7 = vpack.c.bf16 %v306_v6, %v305_v5 }
 0x15c   :  { %405 = vmatprep.mubr.bf16.mxu1 %v768_v32 }
 0x163   :  { %631 = vmatmul.mubr.msk.bf16.gmra.mxu1 %vm219_vm0, %v308_v7 }
 0x21b   :  { %v397_v8 = vpop.f32.mrf.mxu1 }
 0x21d   :  { %v399_v9 = vpop.f32.mrf.mxu1 }
 0x21f   :  { %v401_v10 = vpop.f32.mrf.mxu1 }
 0x220   :  { %v418_v15 = vadd.f32 %v401_v10, %v397_v8 }
 0x221   :  { %v403_v13 = vpop.f32.mrf.mxu1 }
 0x222   :  { %v427_v17 = vadd.f32 %v403_v13, %v399_v9 }
 0x223   :  { %v407_v14 = vpop.f32.mrf.mxu1 }
 0x224   :  { %v419_v18 = vadd.f32 %v418_v15, %v407_v14 }
 0x225   :  { %v409_v16 = vpop.f32.mrf.mxu1 }
 0x226   :  { %v428_v24 = vadd.f32 %v427_v17, %v409_v16 }
 0x227   :  { %v411_v23 = vpop.f32.mrf.mxu1 }
 0x228   :  { %v420_v27 = vadd.f32 %v419_v18, %v411_v23 }
 0x229   :  { %v413_v28 = vpop.f32.mrf.mxu1 }
 0x22a   :  { %v421_v29 = vrot.slane %v420_v27, 4  ;;  %v429_v32 = vadd.f32 %v428_v24, %v413_v28 }
 0x22c   :  { %v422_v30 = vadd.f32 %v421_v29, %v420_v27  ;;  %v430_v31 = vrot.slane %v429_v32, 4  ;;  %v416_v29 = vld [vmem:[%s1000_s5] sm:$0x3]  ;;  %s769_s5 = smov [#allocation2]  }
 0x22e   :  { %v423_v33 = vrot.slane %v422_v30, 2  ;;  %v431_v34 = vadd.f32 %v430_v31, %v429_v32  ;;  %v417_v32 = vld [vmem:[%s1001_s6] sm:$0x3]  ;;  %s593_s6 = sshll.u32 %s769_s5, 4  ;;  %s594_s6 = int_to_ptr.vmem [resolvable:$true] %s593_s6 }
 0x22f   :  { %s746_s1 = scalar_lea.vmem %s594_s6, 1024  ;;  %p751_p1 = scmp.lt.s32.totalorder %s594_s6, %s594_s6 }
 0x230   :  { %v424_v35 = vadd.f32 %v423_v33, %v422_v30  ;;  %v432_v36 = vrot.slane %v431_v34, 2  ;;  %p747_p0 = scmp.ne.s32.totalorder %s594_s6, %s746_s1  ;;  %p752_p2 = scmp.lt.s32.totalorder %s746_s1, %s746_s1 }
 0x232   :  { %v425_v37 = vrot.slane %v424_v35, 1  ;;  %v433_v38 = vadd.f32 %v432_v36, %v431_v34  ;;  %p753_p3 = por %p752_p2, %p751_p1 }
 0x234   :  { %v426_v39 = vadd.f32 %v425_v37, %v424_v35  ;;  %v434_v40 = vrot.slane %v433_v38, 1  ;;  %p754_p4 = pnand %p753_p3, %p747_p0 }
 0x236   :  { %v436_v41 = vmul.f32 0.03125, %v426_v39  ;;  %v435_v42 = vadd.f32 %v434_v40, %v433_v38 }
 0x238   :  { %v438_v43 = vsub.f32 %v397_v8, %v436_v41  ;;  %v440_v44 = vsub.f32 %v401_v10, %v436_v41  ;;  %v442_v45 = vsub.f32 %v407_v14, %v436_v41  ;;  %v437_v46 = vmul.f32 0.03125, %v435_v42 }
 0x239   :  { %v444_v47 = vsub.f32 %v411_v23, %v436_v41  ;;  %v487_v23 = vlaneseq }
 0x23a   :  { %v446_v48 = vmul.f32 %v438_v43, %v438_v43  ;;  %v448_v49 = vmul.f32 %v440_v44, %v440_v44  ;;  %v439_v50 = vsub.f32 %v399_v9, %v437_v46  ;;  %v441_v51 = vsub.f32 %v403_v13, %v437_v46 }
 0x23b   :  { %v443_v52 = vsub.f32 %v409_v16, %v437_v46  ;;  %v450_v53 = vmul.f32 %v442_v45, %v442_v45  ;;  %v445_v55 = vsub.f32 %v413_v28, %v437_v46  ;;  %v452_v58 = vmul.f32 %v444_v47, %v444_v47 }
 0x23c   :  { %v454_v54 = vadd.f32 %v448_v49, %v446_v48  ;;  %v447_v56 = vmul.f32 %v439_v50, %v439_v50  ;;  %v449_v57 = vmul.f32 %v441_v51, %v441_v51  ;;  %v488_v27 = vshrl.u32 %v487_v23, 7 }
 0x23d   :  { %v451_v60 = vmul.f32 %v443_v52, %v443_v52  ;;  %v453_v63 = vmul.f32 %v445_v55, %v445_v55 }
 0x23e   :  { %v455_v59 = vadd.f32 %v454_v54, %v450_v53  ;;  %v463_v61 = vadd.f32 %v449_v57, %v447_v56  ;;  %v489_v28 = vsub.s32 0, %v488_v27  ;;  %v493_v30 = vsub.s32 1, %v488_v27 }
 0x240   :  { %v456_v62 = vadd.f32 %v455_v59, %v452_v58  ;;  %v464_v0 = vadd.f32 %v463_v61, %v451_v60  ;;  %v490_v31 = vrot.slane %v416_v29, %v489_v28  ;;  %v509_v34 = vrot.slane %v417_v32, %v489_v28 }
 0x241   :  { %v494_v39 = vrot.slane %v416_v29, %v493_v30  ;;  %v513_v40 = vrot.slane %v417_v32, %v493_v30 }
 0x242   :  { %v457_v1 = vrot.slane %v456_v62, 4  ;;  %v465_v2 = vadd.f32 %v464_v0, %v453_v63 }
 0x244   :  { %v458_v3 = vadd.f32 %v457_v1, %v456_v62  ;;  %v466_v4 = vrot.slane %v465_v2, 4 }
 0x246   :  { %v459_v5 = vrot.slane %v458_v3, 2  ;;  %v467_v6 = vadd.f32 %v466_v4, %v465_v2 }
 0x248   :  { %v460_v7 = vadd.f32 %v459_v5, %v458_v3  ;;  %v468_v8 = vrot.slane %v467_v6, 2 }
 0x24a   :  { %v461_v9 = vrot.slane %v460_v7, 1  ;;  %v469_v10 = vadd.f32 %v468_v8, %v467_v6 }
 0x24c   :  { %v462_v13 = vadd.f32 %v461_v9, %v460_v7  ;;  %v470_v14 = vrot.slane %v469_v10, 1 }
 0x24e   :  { %v472_v15 = vmul.f32 0.03125, %v462_v13  ;;  %v471_v16 = vadd.f32 %v470_v14, %v469_v10 }
 0x250   :  { %v474_v17 = vadd.f32 1e-05, %v472_v15  ;;  %v473_v18 = vmul.f32 0.03125, %v471_v16 }
 0x252   :  { %710 = vrsqrt.f32 %v474_v17  ;;  %v475_v24 = vadd.f32 1e-05, %v473_v18 }
 0x254   :  { %712 = vrsqrt.f32 %v475_v24 }
 0x25f   :  { %v711_v33 = vpop.eup %710 }
 0x260   :  { %v478_v35 = vmul.f32 %v711_v33, %v438_v43  ;;  %v480_v36 = vmul.f32 %v711_v33, %v440_v44  ;;  %v482_v37 = vmul.f32 %v711_v33, %v442_v45  ;;  %v484_v38 = vmul.f32 %v711_v33, %v444_v47 }
 0x261   :  { %v713_v41 = vpop.eup %712 }
 0x262   :  { %v497_v42 = vmul.f32 %v490_v31, %v478_v35  ;;  %v499_v46 = vmul.f32 %v490_v31, %v480_v36  ;;  %v501_v48 = vmul.f32 %v490_v31, %v482_v37  ;;  %v503_v49 = vmul.f32 %v490_v31, %v484_v38 }
 0x263   :  { %v479_v53 = vmul.f32 %v713_v41, %v439_v50  ;;  %v481_v54 = vmul.f32 %v713_v41, %v441_v51  ;;  %v483_v56 = vmul.f32 %v713_v41, %v443_v52  ;;  %v485_v57 = vmul.f32 %v713_v41, %v445_v55 }
 0x264   :  { %v516_v58 = vadd.f32 %v509_v34, %v497_v42  ;;  %v518_v59 = vadd.f32 %v509_v34, %v499_v46  ;;  %v520_v60 = vadd.f32 %v509_v34, %v501_v48  ;;  %v522_v61 = vadd.f32 %v509_v34, %v503_v49 }
 0x265   :  { %v498_v62 = vmul.f32 %v494_v39, %v479_v53  ;;  %v500_v43 = vmul.f32 %v494_v39, %v481_v54  ;;  %v502_v44 = vmul.f32 %v494_v39, %v483_v56  ;;  %v504_v45 = vmul.f32 %v494_v39, %v485_v57 }
 0x266   :  { %v524_v47 = vadd.f32 %v516_v58, %v875_v19  ;;  %v958_v63 = vadd.f32 %v518_v59, %v880_v20  ;;  %v961_v0 = vadd.f32 %v520_v60, %v899_v25  ;;  %v964_v50 = vadd.f32 %v522_v61, %v904_v26 }
 0x267   :  { %v517_v51 = vadd.f32 %v513_v40, %v498_v62  ;;  %v519_v52 = vadd.f32 %v513_v40, %v500_v43  ;;  %v521_v55 = vadd.f32 %v513_v40, %v502_v44  ;;  %v523_v1 = vadd.f32 %v513_v40, %v504_v45 }
 0x268   :  { %v532_v2 = vsub.f32 0.0, %v524_v47  ;;  %v534_v3 = vsub.f32 0.0, %v958_v63  ;;  %v536_v4 = vsub.f32 0.0, %v961_v0  ;;  %v538_v19 = vsub.f32 0.0, %v964_v50 }
 0x269   :  { %v970_v20 = vadd.f32 %v517_v51, %v848_v11  ;;  %v973_v25 = vadd.f32 %v519_v52, %v853_v12  ;;  %v976_v26 = vadd.f32 %v521_v55, %v885_v21  ;;  %v979_v5 = vadd.f32 %v523_v1, %v890_v22 }
 0x26a   :  { %v540_v6 = vmul.f32 1.442695, %v532_v2  ;;  %v544_v7 = vmul.f32 1.442695, %v534_v3  ;;  %v548_v8 = vmul.f32 1.442695, %v536_v4 }
 0x26b   :  { %v552_v9 = vmul.f32 1.442695, %v538_v19  ;;  %v533_v10 = vsub.f32 0.0, %v970_v20  ;;  %v535_v13 = vsub.f32 0.0, %v973_v25  ;;  %v537_v11 = vsub.f32 0.0, %v976_v26 }
 0x26c   :  { %714 = vpow2.f32 %v540_v6  ;;  %v539_v12 = vsub.f32 0.0, %v979_v5 }
 0x26d   :  { %716 = vpow2.f32 %v544_v7  ;;  %v542_v14 = vmul.f32 1.442695, %v533_v10  ;;  %v546_v21 = vmul.f32 1.442695, %v535_v13  ;;  %v550_v15 = vmul.f32 1.442695, %v537_v11 }
 0x26e   :  { %718 = vpow2.f32 %v548_v8  ;;  %v554_v22 = vmul.f32 1.442695, %v539_v12 }
 0x26f   :  { %720 = vpow2.f32 %v552_v9 }
 0x270   :  { %722 = vpow2.f32 %v542_v14 }
 0x271   :  { %724 = vpow2.f32 %v546_v21 }
 0x272   :  { %726 = vpow2.f32 %v550_v15 }
 0x273   :  { %728 = vpow2.f32 %v554_v22 }
 0x279   :  { %v715_v16 = vpop.eup %714 }
 0x27a   :  { %v717_v17 = vpop.eup %716  ;;  %v556_v18 = vadd.f32 1.0, %v715_v16 }
 0x27b   :  { %v719_v23 = vpop.eup %718  ;;  %v558_v24 = vadd.f32 1.0, %v717_v17 }
 0x27c   :  { %v721_v27 = vpop.eup %720  ;;  %v560_v28 = vadd.f32 1.0, %v719_v23  ;;  %730 = vrcp.f32 %v556_v18 }
 0x27d   :  { %v723_v29 = vpop.eup %722  ;;  %v562_v32 = vadd.f32 1.0, %v721_v27  ;;  %732 = vrcp.f32 %v558_v24 }
 0x27e   :  { %v725_v30 = vpop.eup %724  ;;  %734 = vrcp.f32 %v560_v28  ;;  %v557_v31 = vadd.f32 1.0, %v723_v29 }
 0x27f   :  { %v727_v33 = vpop.eup %726  ;;  %736 = vrcp.f32 %v562_v32  ;;  %v559_v34 = vadd.f32 1.0, %v725_v30 }
 0x280   :  { %v729_v35 = vpop.eup %728  ;;  %v561_v36 = vadd.f32 1.0, %v727_v33  ;;  %738 = vrcp.f32 %v557_v31 }
 0x281   :  { %v563_v37 = vadd.f32 1.0, %v729_v35  ;;  %740 = vrcp.f32 %v559_v34 }
 0x282   :  { %742 = vrcp.f32 %v561_v36 }
 0x283   :  { %744 = vrcp.f32 %v563_v37 }
 0x289   :  { %v731_v38 = vpop.eup %730 }
 0x28a   :  { %v733_v39 = vpop.eup %732  ;;  %v572_v40 = vmul.f32 %v731_v38, %v524_v47 }
 0x28b   :  { %v735_v41 = vpop.eup %734  ;;  %v574_v42 = vmul.f32 %v733_v39, %v958_v63 }
 0x28c   :  { %v737_v46 = vpop.eup %736  ;;  %v576_v48 = vmul.f32 %v735_v41, %v961_v0  ;;  %580 = vst [vmem:[#allocation2] sm:$0xff] %v572_v40 }
 0x28d   :  { %v739_v49 = vpop.eup %738  ;;  %v578_v53 = vmul.f32 %v737_v46, %v964_v50  ;;  %582 = vst [vmem:[#allocation2 + $0x10] sm:$0xff] %v574_v42 }
 0x28e   :  { %v741_v54 = vpop.eup %740  ;;  %584 = vst [vmem:[#allocation2 + $0x20] sm:$0xff] %v576_v48  ;;  %v573_v56 = vmul.f32 %v739_v49, %v970_v20 }
 0x28f   :  { %v743_v57 = vpop.eup %742  ;;  %586 = vst [vmem:[#allocation2 + $0x30] sm:$0xff] %v578_v53  ;;  %v575_v58 = vmul.f32 %v741_v54, %v973_v25 }
 0x290   :  { %v745_v59 = vpop.eup %744  ;;  %v577_v60 = vmul.f32 %v743_v57, %v976_v26  ;;  %581 = vst [vmem:[#allocation2 + $0x8] sm:$0xff] %v573_v56 }
 0x291   :  { %v579_v61 = vmul.f32 %v745_v59, %v979_v5  ;;  %583 = vst [vmem:[#allocation2 + $0x18] sm:$0xff] %v575_v58 }
 0x292   :  { %585 = vst [vmem:[#allocation2 + $0x28] sm:$0xff] %v577_v60 }
 0x293   :  { %587 = vst [vmem:[#allocation2 + $0x38] sm:$0xff] %v579_v61 }
 0x294   :  { %757 = shalt.err (!%p754_p4)
}
 0x295   :  { %s770_s22 = smov 256   ;;  %s771_s23 = smov 16  }
 0x296   :  { %599 = dma.vmem_to_hbm [thread:$0]  %s594_s6, 1024, %s1002_s7, [#allocation3], %s770_s22, %s770_s22, %s771_s23  }
 0x297   :  { %766 = dma.done.wait [#allocation3], 1024  }
 0x298   :  { %767 = vsyncadd [#allocation3], 4294966272 }
 0x299   :  { %603 = vsyncpa [#allocation3], 1 }

</bundles_post_ra>
